<compile_context>
chip_gen: v7x
topology: tpu7x:2x2x1
jax: 0.10.0
libtpu: 0.0.40
codegen_flags: <defaults>
</compile_context>

<pallas_src>
import jax
import jax.numpy as jnp
from jax.experimental import pallas as pl
from jax.experimental.pallas import tpu as pltpu

NEG_SLOPE = 0.1   # get_nn_act_func('leaky_relu') in the fs_net / GDR-Net codebase
LANE = 128


def _round_up(n, m):
    return ((n + m - 1) // m) * m


def _leaky_relu(x):
    # slope < 1  =>  leaky_relu(x) == max(x, slope*x)
    return jnp.maximum(x, NEG_SLOPE * x)


def pose_ts_global_kernel(x_ref, w1_ref, b1_ref, w2_ref, b2_ref, wh_ref, bh_ref,
                          out_ref):
    # x arrives f32 / unpadded-K; the bf16 cast rides in VPU slack (MXU/DMA bound).
    x = x_ref[...].astype(jnp.bfloat16)
    h = jnp.dot(x, w1_ref[...], preferred_element_type=jnp.float32)
    h = _leaky_relu(h + b1_ref[...])

    h = jnp.dot(h.astype(jnp.bfloat16), w2_ref[...],
                preferred_element_type=jnp.float32)
    h = _leaky_relu(h + b2_ref[...])

    # Fused trans|scale head: lane-padded matmul on the MXU, narrow f32 store.
    out = jnp.dot(h.astype(jnp.bfloat16), wh_ref[...],
                  preferred_element_type=jnp.float32)
    n_real = out_ref.shape[1]                       # 2 * 3 * num_classes
    out_ref[...] = (out + bh_ref[...])[:, :n_real].astype(out_ref.dtype)


def pack_params(params):
    """One-time packing (call at init, NOT per forward): pad feat_dim to a lane
    multiple, fuse the two heads (trans|scale), cast matmul weights to bf16,
    keep biases in f32.  Zero padding is an exact no-op for the math."""
    bf16, f32 = jnp.bfloat16, jnp.float32
    in_dim, feat_dim = params["w1"].shape
    out_dim = params["wt"].shape[1]                 # 3 * num_classes
    F = _round_up(feat_dim, LANE)
    OUT = 2 * out_dim                               # fused trans|scale
    OUT_PAD = _round_up(OUT, LANE)

    w1 = jnp.zeros((in_dim, F), bf16).at[:, :feat_dim].set(params["w1"].astype(bf16))
    b1 = jnp.zeros((1, F), f32).at[:, :feat_dim].set(params["b1"].astype(f32))
    w2 = jnp.zeros((F, F), bf16).at[:feat_dim, :feat_dim].set(params["w2"].astype(bf16))
    b2 = jnp.zeros((1, F), f32).at[:, :feat_dim].set(params["b2"].astype(f32))
    wh = (jnp.zeros((F, OUT_PAD), bf16)
          .at[:feat_dim, :out_dim].set(params["wt"].astype(bf16))
          .at[:feat_dim, out_dim:OUT].set(params["ws"].astype(bf16)))
    bh = (jnp.zeros((1, OUT_PAD), f32)
          .at[:, :out_dim].set(params["bt"].astype(f32))
          .at[:, out_dim:OUT].set(params["bs"].astype(f32)))

    packed = {"w1": w1, "b1": b1, "w2": w2, "b2": b2, "wh": wh, "bh": bh}
    return packed, out_dim


def pose_ts_global(x, packed, out_dim, *, tb=1024):
    """x: (B, in_dim) float32; packed: output of pack_params.
    Returns (trans, scale), each (B, 3*num_classes) float32."""
    B, in_dim = x.shape
    w1, b1, w2, b2, wh, bh = (packed[k] for k in ("w1", "b1", "w2", "b2", "wh", "bh"))
    assert w1.shape[0] == in_dim
    F = w1.shape[1]
    OUT_PAD = wh.shape[1]
    OUT = 2 * out_dim                               # real fused-head width

    # Balanced batch tiles; >=2 grid steps when there is enough work so both
    # v7x TensorCores are used (cheap extra step on single-TC v5e/v6e).
    n_tiles = max(pl.cdiv(B, tb), 2 if B >= 16 else 1)
    TB = _round_up(pl.cdiv(B, n_tiles), 8)
    n_tiles = pl.cdiv(B, TB)
    B_pad = n_tiles * TB
    xp = x if B_pad == B else jnp.pad(x, ((0, B_pad - B), (0, 0)))

    # Resident (DMA'd once, index_map (0,0)) weight/bias blocks.  Single-buffer
    # them when feat_dim is large enough that double-buffering the FxF weight
    # would hurt VMEM headroom (v7x: 64 MiB physical / 32 MiB default scoped).
    if F >= 1024:
        def resident(shape):
            return pl.BlockSpec(shape, lambda i: (0, 0), pipeline_mode=pl.Buffered(1))
    else:
        def resident(shape):
            return pl.BlockSpec(shape, lambda i: (0, 0))

    out = pl.pallas_call(
        pose_ts_global_kernel,
        out_shape=jax.ShapeDtypeStruct((B_pad, OUT), jnp.float32),
        grid_spec=pltpu.PrefetchScalarGridSpec(
            num_scalar_prefetch=0,
            grid=(n_tiles,),
            in_specs=[
                pl.BlockSpec((TB, in_dim), lambda i: (i, 0)),  # x tile (f32, unpadded K)
                resident((in_dim, F)),                         # w1
                resident((1, F)),                              # b1
                resident((F, F)),                              # w2
                resident((1, F)),                              # b2
                resident((F, OUT_PAD)),                        # fused head weight
                resident((1, OUT_PAD)),                        # fused head bias
            ],
            out_specs=pl.BlockSpec((TB, OUT), lambda i: (i, 0)),
        ),
        compiler_params=pltpu.CompilerParams(
            dimension_semantics=("parallel",),   # megacore sharding on v7x
        ),
    )(xp, w1, b1, w2, b2, wh, bh)

    trans = out[:B, :out_dim]
    scale = out[:B, out_dim:OUT]
    return trans, scale


def init_params(key, in_dim, feat_dim, num_classes=1, *, std_hidden=0.001, std_head=0.01):
    """Mirrors Pose_Ts_global._init_weights defaults (hidden Linear: normal std=0.001,
    fc_t/fc_s: normal std=0.01, biases zero).  Weights stored pre-transposed as
    (in_features, out_features)."""
    k1, k2, kt, ks = jax.random.split(key, 4)
    out_dim = 3 * num_classes
    f32 = jnp.float32
    return {
        "w1": jax.random.normal(k1, (in_dim, feat_dim), f32) * std_hidden,
        "b1": jnp.zeros((1, feat_dim), f32),
        "w2": jax.random.normal(k2, (feat_dim, feat_dim), f32) * std_hidden,
        "b2": jnp.zeros((1, feat_dim), f32),
        "wt": jax.random.normal(kt, (feat_dim, out_dim), f32) * std_head,
        "bt": jnp.zeros((1, out_dim), f32),
        "ws": jax.random.normal(ks, (feat_dim, out_dim), f32) * std_head,
        "bs": jnp.zeros((1, out_dim), f32),
    }


def reference_f32(x, p):
    """Full-f32 reference: exact semantics of the PyTorch module."""
    h = _leaky_relu(x @ p["w1"] + p["b1"])
    h = _leaky_relu(h @ p["w2"] + p["b2"])
    return h @ p["wt"] + p["bt"], h @ p["ws"] + p["bs"]


def reference_bf16(x, p):
    """Reference with the kernel's dtype handling (bf16 matmul operands, f32 accum)."""
    bf16 = jnp.bfloat16
    h = _leaky_relu(jnp.dot(x.astype(bf16), p["w1"].astype(bf16),
                            preferred_element_type=jnp.float32) + p["b1"])
    h = _leaky_relu(jnp.dot(h.astype(bf16), p["w2"].astype(bf16),
                            preferred_element_type=jnp.float32) + p["b2"])
    hb = h.astype(bf16)
    t = jnp.dot(hb, p["wt"].astype(bf16), preferred_element_type=jnp.float32) + p["bt"]
    s = jnp.dot(hb, p["ws"].astype(bf16), preferred_element_type=jnp.float32) + p["bs"]
    return t, s


if __name__ == "__main__":
    key = jax.random.PRNGKey(0)
    kx, kp = jax.random.split(key)

    B = 8            # batch
    IN_DIM = 32      # FLAGS.feat_global_pcl (small synthetic value)
    FEAT_DIM = 64    # feat_dim (module default is 256; small synthetic value)
    NUM_CLASSES = 1

    x = jax.random.normal(kx, (B, IN_DIM), jnp.float32)
    # Larger std than the module's _init_weights (0.001 / 0.01) so outputs are
    # O(1) and the bf16-level tolerance checks are actually exercised.
    params = init_params(kp, IN_DIM, FEAT_DIM, NUM_CLASSES,
                         std_hidden=0.2, std_head=0.2)

    packed, out_dim = pack_params(params)          # one-time packing
    trans, scale = pose_ts_global(x, packed, out_dim)
    jax.block_until_ready((trans, scale))

    assert trans.shape == (B, 3 * NUM_CLASSES) and scale.shape == (B, 3 * NUM_CLASSES)

    # Tight check vs. a reference with matching dtype handling.
    t_bf, s_bf = reference_bf16(x, params)
    assert jnp.allclose(trans, t_bf, atol=1e-3, rtol=1e-3)
    assert jnp.allclose(scale, s_bf, atol=1e-3, rtol=1e-3)

    # Looser check vs. full-f32 module semantics (bf16 rounding tolerance).
    t_f32, s_f32 = reference_f32(x, params)
    assert jnp.allclose(trans, t_f32, atol=5e-2, rtol=5e-2)
    assert jnp.allclose(scale, s_f32, atol=5e-2, rtol=5e-2)

    print("KERNEL_OK")
</pallas_src>

<mosaic_0001>
module attributes {stable_mosaic.version = 11 : i64} {
  func.func @pose_ts_global_kernel(%arg0: i32, %arg1: memref<8x32xf32, #tpu.memory_space<vmem>>, %arg2: memref<32x128xbf16, #tpu.memory_space<vmem>>, %arg3: memref<1x128xf32, #tpu.memory_space<vmem>>, %arg4: memref<128x128xbf16, #tpu.memory_space<vmem>>, %arg5: memref<1x128xf32, #tpu.memory_space<vmem>>, %arg6: memref<128x128xbf16, #tpu.memory_space<vmem>>, %arg7: memref<1x128xf32, #tpu.memory_space<vmem>>, %arg8: memref<8x6xf32, #tpu.memory_space<vmem>>) attributes {dimension_semantics = [#tpu.dimension_semantics<parallel>], iteration_bounds = array<i64: 1>, scalar_prefetch = 0 : i64, scratch_operands = 0 : i64, tpu.core_type = #tpu.core_type<tc>, window_params = [{transform_indices = @transform_0, window_bounds = array<i64: 8, 32>}, {pipeline_mode = #tpu.pipeline_mode<synchronous>, transform_indices = @transform_1, window_bounds = array<i64: 32, 128>}, {pipeline_mode = #tpu.pipeline_mode<synchronous>, transform_indices = @transform_2, window_bounds = array<i64: 1, 128>}, {pipeline_mode = #tpu.pipeline_mode<synchronous>, transform_indices = @transform_3, window_bounds = array<i64: 128, 128>}, {pipeline_mode = #tpu.pipeline_mode<synchronous>, transform_indices = @transform_4, window_bounds = array<i64: 1, 128>}, {pipeline_mode = #tpu.pipeline_mode<synchronous>, transform_indices = @transform_5, window_bounds = array<i64: 128, 128>}, {pipeline_mode = #tpu.pipeline_mode<synchronous>, transform_indices = @transform_6, window_bounds = array<i64: 1, 128>}, {transform_indices = @transform_7, window_bounds = array<i64: 8, 6>}]} {
    %c0 = arith.constant 0 : index
    %c0_0 = arith.constant 0 : index
    %0 = vector.load %arg1[%c0, %c0_0] : memref<8x32xf32, #tpu.memory_space<vmem>>, vector<8x32xf32>
    %1 = arith.truncf %0 : vector<8x32xf32> to vector<8x32xbf16>
    %c0_1 = arith.constant 0 : index
    %c0_2 = arith.constant 0 : index
    %2 = vector.load %arg2[%c0_1, %c0_2] : memref<32x128xbf16, #tpu.memory_space<vmem>>, vector<32x128xbf16>
    %cst = arith.constant dense<0.000000e+00> : vector<8x128xf32>
    %3 = tpu.matmul %1, %2, %cst {dimension_numbers = #tpu.dot_dimension_numbers<[1], [0], [0], [1], [0, 0, 1, 1], [], []>} : vector<8x32xbf16>, vector<32x128xbf16>, vector<8x128xf32> -> vector<8x128xf32>
    %c0_3 = arith.constant 0 : index
    %c0_4 = arith.constant 0 : index
    %4 = vector.load %arg3[%c0_3, %c0_4] : memref<1x128xf32, #tpu.memory_space<vmem>>, vector<1x128xf32>
    %5 = vector.broadcast %4 : vector<1x128xf32> to vector<8x128xf32>
    %6 = arith.addf %3, %5 : vector<8x128xf32>
    %cst_5 = arith.constant 1.000000e-01 : f32
    %7 = vector.broadcast %cst_5 : f32 to vector<8x128xf32>
    %8 = arith.mulf %7, %6 : vector<8x128xf32>
    %9 = arith.maximumf %6, %8 : vector<8x128xf32>
    %10 = arith.truncf %9 : vector<8x128xf32> to vector<8x128xbf16>
    %c0_6 = arith.constant 0 : index
    %c0_7 = arith.constant 0 : index
    %11 = vector.load %arg4[%c0_6, %c0_7] : memref<128x128xbf16, #tpu.memory_space<vmem>>, vector<128x128xbf16>
    %cst_8 = arith.constant dense<0.000000e+00> : vector<8x128xf32>
    %12 = tpu.matmul %10, %11, %cst_8 {dimension_numbers = #tpu.dot_dimension_numbers<[1], [0], [0], [1], [0, 0, 1, 1], [], []>} : vector<8x128xbf16>, vector<128x128xbf16>, vector<8x128xf32> -> vector<8x128xf32>
    %c0_9 = arith.constant 0 : index
    %c0_10 = arith.constant 0 : index
    %13 = vector.load %arg5[%c0_9, %c0_10] : memref<1x128xf32, #tpu.memory_space<vmem>>, vector<1x128xf32>
    %14 = vector.broadcast %13 : vector<1x128xf32> to vector<8x128xf32>
    %15 = arith.addf %12, %14 : vector<8x128xf32>
    %cst_11 = arith.constant 1.000000e-01 : f32
    %16 = vector.broadcast %cst_11 : f32 to vector<8x128xf32>
    %17 = arith.mulf %16, %15 : vector<8x128xf32>
    %18 = arith.maximumf %15, %17 : vector<8x128xf32>
    %19 = arith.truncf %18 : vector<8x128xf32> to vector<8x128xbf16>
    %c0_12 = arith.constant 0 : index
    %c0_13 = arith.constant 0 : index
    %20 = vector.load %arg6[%c0_12, %c0_13] : memref<128x128xbf16, #tpu.memory_space<vmem>>, vector<128x128xbf16>
    %cst_14 = arith.constant dense<0.000000e+00> : vector<8x128xf32>
    %21 = tpu.matmul %19, %20, %cst_14 {dimension_numbers = #tpu.dot_dimension_numbers<[1], [0], [0], [1], [0, 0, 1, 1], [], []>} : vector<8x128xbf16>, vector<128x128xbf16>, vector<8x128xf32> -> vector<8x128xf32>
    %c0_15 = arith.constant 0 : index
    %c0_16 = arith.constant 0 : index
    %22 = vector.load %arg7[%c0_15, %c0_16] : memref<1x128xf32, #tpu.memory_space<vmem>>, vector<1x128xf32>
    %23 = vector.broadcast %22 : vector<1x128xf32> to vector<8x128xf32>
    %24 = arith.addf %21, %23 : vector<8x128xf32>
    %25 = vector.extract_strided_slice %24 {offsets = [0, 0], sizes = [8, 6], strides = [1, 1]} : vector<8x128xf32> to vector<8x6xf32>
    %c0_17 = arith.constant 0 : index
    %c0_18 = arith.constant 0 : index
    %26 = vector.load %arg8[%c0_17, %c0_18] : memref<8x6xf32, #tpu.memory_space<vmem>>, vector<8x6xf32>
    tpu.vector_store %arg8[%c0_17, %c0_18], %25 {strides = array<i32>} : memref<8x6xf32, #tpu.memory_space<vmem>>, vector<8x6xf32>,
    return
  }
  func.func @transform_0(%arg0: i32) -> (i32, i32) {
    %c0_i32 = arith.constant 0 : i32
    %c0_i32_0 = arith.constant 0 : i32
    return %arg0, %c0_i32 : i32, i32
  }
  func.func @transform_1(%arg0: i32) -> (i32, i32) {
    %c0_i32 = arith.constant 0 : i32
    %c0_i32_0 = arith.constant 0 : i32
    %c0_i32_1 = arith.constant 0 : i32
    return %c0_i32, %c0_i32_0 : i32, i32
  }
  func.func @transform_2(%arg0: i32) -> (i32, i32) {
    %c0_i32 = arith.constant 0 : i32
    %c0_i32_0 = arith.constant 0 : i32
    %c0_i32_1 = arith.constant 0 : i32
    return %c0_i32, %c0_i32_0 : i32, i32
  }
  func.func @transform_3(%arg0: i32) -> (i32, i32) {
    %c0_i32 = arith.constant 0 : i32
    %c0_i32_0 = arith.constant 0 : i32
    %c0_i32_1 = arith.constant 0 : i32
    return %c0_i32, %c0_i32_0 : i32, i32
  }
  func.func @transform_4(%arg0: i32) -> (i32, i32) {
    %c0_i32 = arith.constant 0 : i32
    %c0_i32_0 = arith.constant 0 : i32
    %c0_i32_1 = arith.constant 0 : i32
    return %c0_i32, %c0_i32_0 : i32, i32
  }
  func.func @transform_5(%arg0: i32) -> (i32, i32) {
    %c0_i32 = arith.constant 0 : i32
    %c0_i32_0 = arith.constant 0 : i32
    %c0_i32_1 = arith.constant 0 : i32
    return %c0_i32, %c0_i32_0 : i32, i32
  }
  func.func @transform_6(%arg0: i32) -> (i32, i32) {
    %c0_i32 = arith.constant 0 : i32
    %c0_i32_0 = arith.constant 0 : i32
    %c0_i32_1 = arith.constant 0 : i32
    return %c0_i32, %c0_i32_0 : i32, i32
  }
  func.func @transform_7(%arg0: i32) -> (i32, i32) {
    %c0_i32 = arith.constant 0 : i32
    %c0_i32_0 = arith.constant 0 : i32
    return %arg0, %c0_i32 : i32, i32
  }
}

</mosaic_0001>

<bundles_post_ra>
// kernel: tpu_custom_call.1
= control target key start
LH: loop header
LB: loop body
LE: loop exit
PB: predicated region body
PF: predicated region fallthrough
CT: control target
= control target key end

     0   :  { %12 = vsyncpa [#allocation3], 0  ;;  %s784_s0 = inlined_call_operand.hbm [shape: f32[8,32], index: 0, kind: input, shape index: {}]   ;;  %s785_s1 = inlined_call_operand.hbm [shape: bf16[32,128], index: 1, kind: input, shape index: {}]   ;;  %s786_s2 = inlined_call_operand.vmem [shape: f32[1,128], index: 2, kind: input, shape index: {}]   ;;  %s787_s3 = inlined_call_operand.hbm [shape: bf16[128,128], index: 3, kind: input, shape index: {}]   ;;  %s788_s4 = inlined_call_operand.vmem [shape: f32[1,128], index: 4, kind: input, shape index: {}]   ;;  %s789_s5 = inlined_call_operand.hbm [shape: bf16[128,128], index: 5, kind: input, shape index: {}]   ;;  %s790_s6 = inlined_call_operand.vmem [shape: f32[1,128], index: 6, kind: input, shape index: {}]   ;;  %s791_s7 = inlined_call_operand.hbm [shape: f32[8,6], index: 7, kind: output, shape index: {}]  }
   0x1   :  { %13 = vsyncpa [#allocation6], 0 }
   0x2   :  { %14 = vsyncpa [#allocation9], 0 }
   0x3   :  { %15 = vsyncpa [#allocation4], 0  ;;  %s633_s24 = smov [#allocation5]   ;;  %s515_s28 = scalar_lea.hbm %s785_s1, 256 }
   0x4   :  { %s31_s25 = sshll.u32 %s633_s24, 4  ;;  %p516_p0 = scmp.ne.s32.totalorder %s785_s1, %s515_s28  ;;  %s32_s25 = int_to_ptr.vmem [resolvable:$true] %s31_s25 }
   0x5   :  { %p519_p1 = scmp.lt.u32.totalorder %s515_s28, %s785_s1 }
   0x7   :  { %p521_p2 = pnand %p519_p1, %p516_p0 }
   0x9   :  { %524 = shalt.err (!%p521_p2)
}
   0xa   :  { %s525_s10 = scalar_lea.vmem %s32_s25, 256  ;;  %p530_p4 = scmp.lt.s32.totalorder %s32_s25, %s32_s25 }
   0xb   :  { %p526_p3 = scmp.ne.s32.totalorder %s32_s25, %s525_s10  ;;  %p531_p5 = scmp.lt.s32.totalorder %s525_s10, %s525_s10 }
   0xd   :  { %p532_p6 = por %p531_p5, %p530_p4 }
   0xf   :  { %p533_p7 = pnand %p532_p6, %p526_p3 }
  0x11   :  { %536 = shalt.err (!%p533_p7)
}
  0x12   :  { %s634_s11 = smov 64   ;;  %s635_s12 = smov 4  }
  0x13   :  { %37 = dma.hbm_to_vmem [thread:$0]  %s785_s1, 256, %s32_s25, [#allocation6], %s634_s11, %s634_s11, %s635_s12  }
  0x14   :  { %s636_s15 = smov [#allocation2]   ;;  %s637_s17 = smov [#allocation7]  }
  0x15   :  { %s22_s16 = sshll.u32 %s636_s15, 4  ;;  %s45_s18 = sshll.u32 %s637_s17, 4  ;;  %s23_s16 = int_to_ptr.vmem [resolvable:$true] %s22_s16  ;;  %s46_s18 = int_to_ptr.vmem [resolvable:$true] %s45_s18 }
  0x16   :  { %s537_s21 = scalar_lea.hbm %s784_s0, 128 }
  0x17   :  { %p538_p8 = scmp.ne.s32.totalorder %s784_s0, %s537_s21  ;;  %p541_p9 = scmp.lt.u32.totalorder %s537_s21, %s784_s0 }
  0x19   :  { %p543_p10 = pnand %p541_p9, %p538_p8 }
  0x1b   :  { %546 = shalt.err (!%p543_p10)
}
  0x1c   :  { %s547_s1 = scalar_lea.vmem %s23_s16, 128  ;;  %p552_p12 = scmp.lt.s32.totalorder %s23_s16, %s23_s16 }
  0x1d   :  { %p548_p11 = scmp.ne.s32.totalorder %s23_s16, %s547_s1  ;;  %p553_p13 = scmp.lt.s32.totalorder %s547_s1, %s547_s1 }
  0x1f   :  { %p554_p0 = por %p553_p13, %p552_p12 }
  0x21   :  { %p555_p1 = pnand %p554_p0, %p548_p11 }
  0x23   :  { %558 = shalt.err (!%p555_p1)
}
  0x24   :  { %25 = dma.hbm_to_vmem [thread:$0]  %s784_s0, 128, %s23_s16, [#allocation3]  }
  0x25   :  { %s559_s30 = scalar_lea.hbm %s787_s3, 1024 }
  0x26   :  { %p560_p2 = scmp.ne.s32.totalorder %s787_s3, %s559_s30  ;;  %p563_p3 = scmp.lt.u32.totalorder %s559_s30, %s787_s3 }
  0x28   :  { %p565_p4 = pnand %p563_p3, %p560_p2 }
  0x2a   :  { %568 = shalt.err (!%p565_p4)
}
  0x2b   :  { %s569_s14 = scalar_lea.vmem %s46_s18, 1024  ;;  %p574_p6 = scmp.lt.s32.totalorder %s46_s18, %s46_s18 }
  0x2c   :  { %p570_p5 = scmp.ne.s32.totalorder %s46_s18, %s569_s14  ;;  %p575_p7 = scmp.lt.s32.totalorder %s569_s14, %s569_s14 }
  0x2e   :  { %p576_p8 = por %p575_p7, %p574_p6 }
  0x30   :  { %p577_p9 = pnand %p576_p8, %p570_p5 }
  0x32   :  { %580 = shalt.err (!%p577_p9)
}
  0x33   :  { %51 = dma.hbm_to_vmem [thread:$0]  %s787_s3, 1024, %s46_s18, [#allocation6], %s634_s11, %s634_s11, %s635_s12  }
  0x34   :  { %s638_s16 = smov [#allocation8]   ;;  %s581_s21 = scalar_lea.hbm %s789_s5, 1024 }
  0x35   :  { %s59_s17 = sshll.u32 %s638_s16, 4  ;;  %p582_p10 = scmp.ne.s32.totalorder %s789_s5, %s581_s21  ;;  %s60_s17 = int_to_ptr.vmem [resolvable:$true] %s59_s17 }
  0x36   :  { %p585_p11 = scmp.lt.u32.totalorder %s581_s21, %s789_s5 }
  0x38   :  { %p587_p12 = pnand %p585_p11, %p582_p10 }
  0x3a   :  { %590 = shalt.err (!%p587_p12)
}
  0x3b   :  { %s591_s1 = scalar_lea.vmem %s60_s17, 1024  ;;  %p596_p0 = scmp.lt.s32.totalorder %s60_s17, %s60_s17 }
  0x3c   :  { %p592_p13 = scmp.ne.s32.totalorder %s60_s17, %s591_s1  ;;  %p597_p1 = scmp.lt.s32.totalorder %s591_s1, %s591_s1 }
  0x3e   :  { %p598_p2 = por %p597_p1, %p596_p0 }
  0x40   :  { %p599_p3 = pnand %p598_p2, %p592_p13 }
  0x42   :  { %602 = shalt.err (!%p599_p3)
}
  0x43   :  { %65 = dma.hbm_to_vmem [thread:$0]  %s789_s5, 1024, %s60_s17, [#allocation9], %s634_s11, %s634_s11, %s635_s12  }
  0x44   :  { %625 = dma.done.wait [#allocation3], 128  }
  0x45   :  { %626 = vsyncadd [#allocation3], 4294967168 }
  0x46   :  { %627 = dma.done.wait [#allocation6], 1280  }
  0x47   :  { %628 = vsyncadd [#allocation6], 4294966016 }
  0x48   :  { %629 = dma.done.wait [#allocation9], 1024  }
  0x49   :  { %630 = vsyncadd [#allocation9], 4294966272  ;;  %v639_v0 = vmov 0.0   ;;  %vm640_vm0 = vmmov 0   ;;  %v497_v1 = vld [vmem:[#allocation5] sm:$0xff]   ;;  %v498_v2 = vld [vmem:[#allocation5 + $0x8] sm:$0xff]  }
  0x4a   :  { %440 = vmatprep.subr.bf16.mxu0 %v639_v0  ;;  %444 = vmatprep.mubr.msk.bf16.mxu0 %vm640_vm0, %v639_v0  ;;  %v81_v3 = vld [vmem:[#allocation2] sm:$0xff]  ;;  %v499_v4 = vld [vmem:[#allocation7] sm:$0xff]   ;;  %vm106_vm1 = vcmask 261120   ;;  %v501_v7 = vld [vmem:[#allocation7 + $0x10] sm:$0xff]   ;;  %s641_s28 = smov [#allocation10]   ;;  %vm378_vm2 = vcmask 48128  }
  0x4b   :  { %448 = vmatprep.subr.bf16.mxu1 %v639_v0  ;;  %464 = vmatprep.mubr.msk.bf16.mxu1 %vm640_vm0, %v639_v0  ;;  %v82_v5 = vpack.c.bf16 %v81_v3, %v81_v3  ;;  %v500_v6 = vld [vmem:[#allocation7 + $0x8] sm:$0xff]   ;;  %v502_v8 = vld [vmem:[#allocation7 + $0x18] sm:$0xff]   ;;  %v503_v9 = vld [vmem:[#allocation7 + $0x20] sm:$0xff]   ;;  %s386_s29 = sshll.u32 %s641_s28, 4  ;;  %s387_s29 = int_to_ptr.vmem [resolvable:$true] %s386_s29 }
  0x4c   :  { %441 = vmatpush3.bf16.msra.mxu0 %v497_v1  ;;  %449 = vmatpush3.bf16.msra.mxu1 %v499_v4  ;;  %v504_v10 = vld [vmem:[#allocation7 + $0x28] sm:$0xff]   ;;  %v505_v11 = vld [vmem:[#allocation7 + $0x30] sm:$0xff]   ;;  %v506_v12 = vld [vmem:[#allocation7 + $0x38] sm:$0xff]   ;;  %p608_p5 = scmp.lt.s32.totalorder %s387_s29, %s387_s29 }
  0x4d   :  { %442 = vmatprep.subr.bf16.mxu0 %v639_v0  ;;  %450 = vmatprep.subr.bf16.mxu1 %v639_v0  ;;  %v507_v13 = vld [vmem:[#allocation8] sm:$0xff]   ;;  %v508_v14 = vld [vmem:[#allocation8 + $0x8] sm:$0xff]   ;;  %v509_v15 = vld [vmem:[#allocation8 + $0x10] sm:$0xff]  }
  0x4e   :  { %v510_v16 = vld [vmem:[#allocation8 + $0x18] sm:$0xff]   ;;  %v511_v17 = vld [vmem:[#allocation8 + $0x20] sm:$0xff]   ;;  %v512_v18 = vld [vmem:[#allocation8 + $0x28] sm:$0xff]  }
  0x4f   :  { %v397_v19 = vld [vmem:[%s786_s2] ss:$0 sm:$0xff]  ;;  %v513_v28 = vld [vmem:[#allocation8 + $0x30] sm:$0xff]   ;;  %v514_v29 = vld [vmem:[#allocation8 + $0x38] sm:$0xff]  }
  0x50   :  { %443 = vmatpush3.bf16.msra.mxu0 %v498_v2  ;;  %451 = vmatpush3.bf16.msra.mxu1 %v500_v6  ;;  %v401_v30 = vld [vmem:[%s788_s4] ss:$0 sm:$0xff]  ;;  %s603_s4 = scalar_lea.vmem %s387_s29, 128 }
  0x51   :  { %468 = vmatprep.subr.bf16.mxu0 %v639_v0  ;;  %452 = vmatprep.subr.bf16.mxu1 %v639_v0  ;;  %v410_v39 = vld [vmem:[%s790_s6] ss:$0 sm:$0xff]  ;;  %p604_p4 = scmp.ne.s32.totalorder %s387_s29, %s603_s4  ;;  %p609_p6 = scmp.lt.s32.totalorder %s603_s4, %s603_s4 }
  0x53   :  { %445 = vmatmul.mubr.msk.bf16.vlgmr.msra.gmra.mrb[0].mxu0 %vm106_vm1, %v82_v5  ;;  %p610_p7 = por %p609_p6, %p608_p5 }
  0x54   :  { %484 = vmatprep.mubr.msk.bf16.mxu0 %vm640_vm0, %v639_v0  ;;  %453 = vmatpush3.bf16.msra.mxu1 %v501_v7 }
  0x55   :  { %454 = vmatprep.subr.bf16.mxu1 %v639_v0  ;;  %469 = vmatpush3.bf16.msra.mxu0 %v507_v13  ;;  %p611_p8 = pnand %p610_p7, %p604_p4 }
  0x56   :  { %470 = vmatprep.subr.bf16.mxu0 %v639_v0 }
  0x58   :  { %455 = vmatpush3.bf16.msra.mxu1 %v502_v8 }
  0x59   :  { %456 = vmatprep.subr.bf16.mxu1 %v639_v0  ;;  %471 = vmatpush3.bf16.msra.mxu0 %v508_v14 }
  0x5a   :  { %472 = vmatprep.subr.bf16.mxu0 %v639_v0 }
  0x5c   :  { %457 = vmatpush3.bf16.msra.mxu1 %v503_v9 }
  0x5d   :  { %458 = vmatprep.subr.bf16.mxu1 %v639_v0  ;;  %473 = vmatpush3.bf16.msra.mxu0 %v509_v15 }
  0x5e   :  { %474 = vmatprep.subr.bf16.mxu0 %v639_v0 }
  0x60   :  { %459 = vmatpush3.bf16.msra.mxu1 %v504_v10 }
  0x61   :  { %460 = vmatprep.subr.bf16.mxu1 %v639_v0  ;;  %475 = vmatpush3.bf16.msra.mxu0 %v510_v16 }
  0x62   :  { %476 = vmatprep.subr.bf16.mxu0 %v639_v0 }
  0x64   :  { %461 = vmatpush3.bf16.msra.mxu1 %v505_v11 }
  0x65   :  { %462 = vmatprep.subr.bf16.mxu1 %v639_v0  ;;  %477 = vmatpush3.bf16.msra.mxu0 %v511_v17 }
  0x66   :  { %478 = vmatprep.subr.bf16.mxu0 %v639_v0 }
  0x68   :  { %463 = vmatpush3.bf16.msra.mxu1 %v506_v12 }
  0x69   :  { %479 = vmatpush3.bf16.msra.mxu0 %v512_v18 }
  0x6a   :  { %480 = vmatprep.subr.bf16.mxu0 %v639_v0 }
  0x6d   :  { %481 = vmatpush3.bf16.msra.mxu0 %v513_v28 }
  0x6e   :  { %482 = vmatprep.subr.bf16.mxu0 %v639_v0 }
  0x71   :  { %483 = vmatpush3.bf16.msra.mxu0 %v514_v29 }
 0x126   :  { %v144_v20 = vpop.f32.mrb[0].mxu0 }
 0x127   :  { %v145_v21 = vadd.f32 %v397_v19, %v144_v20  ;;  %v446_v22 = vpop.f32.mrb[1].mxu0 }
 0x128   :  { %v147_v23 = vpop.f32.mrb[2].mxu0 }
 0x129   :  { %v150_v24 = vmul.f32 0.1, %v145_v21  ;;  %v447_v25 = vpop.f32.mrb[3].mxu0 }
 0x12b   :  { %v151_v26 = vmax.f32 %v145_v21, %v150_v24 }
 0x12d   :  { %v152_v27 = vpack.c.bf16 %v151_v26, %v151_v26 }
 0x12f   :  { %465 = vmatmul.mubr.bf16.vlgmr.msra.gmra.mrb[0].mxu1 %v152_v27 }
 0x202   :  { %v258_v31 = vpop.f32.mrb[0].mxu1 }
 0x203   :  { %v259_v32 = vadd.f32 %v401_v30, %v258_v31  ;;  %v466_v33 = vpop.f32.mrb[1].mxu1 }
 0x204   :  { %v261_v34 = vpop.f32.mrb[2].mxu1 }
 0x205   :  { %v264_v35 = vmul.f32 0.1, %v259_v32  ;;  %v467_v36 = vpop.f32.mrb[3].mxu1 }
 0x207   :  { %v265_v37 = vmax.f32 %v259_v32, %v264_v35 }
 0x209   :  { %v266_v38 = vpack.c.bf16 %v265_v37, %v265_v37 }
 0x20b   :  { %485 = vmatmul.mubr.bf16.vlgmr.msra.gmra.mrb[4].mxu0 %v266_v38 }
 0x2de   :  { %v372_v40 = vpop.f32.mrb[4].mxu0 }
 0x2df   :  { %v373_v41 = vadd.f32 %v410_v39, %v372_v40  ;;  %v486_v42 = vpop.f32.mrb[5].mxu0 }
 0x2e0   :  { %v375_v43 = vpop.f32.mrb[6].mxu0 }
 0x2e1   :  { %v487_v44 = vpop.f32.mrb[7].mxu0  ;;  %379 = vst.msk [vmem:[#allocation10] sm:$0xff] %vm378_vm2, %v373_v41 }
 0x2e2   :  { %614 = shalt.err (!%p611_p8)
}
 0x2e3   :  { %s615_s6 = scalar_lea.hbm %s791_s7, 128 }
 0x2e4   :  { %p616_p9 = scmp.ne.s32.totalorder %s791_s7, %s615_s6  ;;  %p619_p10 = scmp.lt.u32.totalorder %s615_s6, %s791_s7 }
 0x2e6   :  { %p621_p11 = pnand %p619_p10, %p616_p9 }
 0x2e8   :  { %624 = shalt.err (!%p621_p11)
}
 0x2e9   :  { %389 = dma.vmem_to_hbm [thread:$0]  %s387_s29, 128, %s791_s7, [#allocation4]  }
 0x2ea   :  { %631 = dma.done.wait [#allocation4], 128  }
 0x2eb   :  { %632 = vsyncadd [#allocation4], 4294967168 }
 0x2ec   :  { %393 = vsyncpa [#allocation3], 1 }
 0x2ed   :  { %394 = vsyncpa [#allocation6], 1 }
 0x2ee   :  { %395 = vsyncpa [#allocation9], 1 }
 0x2ef   :  { %396 = vsyncpa [#allocation4], 1 }

</bundles_post_ra>
